<compile_context>
chip_gen: v5e
topology: v5e:2x2
jax: 0.10.0
libtpu: 0.0.40
codegen_flags: <defaults>
</compile_context>

<pallas_src>
import jax
import jax.numpy as jnp
from jax import lax
from jax.experimental import pallas as pl
from jax.experimental.pallas import tpu as pltpu

EPS = 1e-5  # PyTorch BatchNorm2d default


def _round_up(x, m):
    return ((x + m - 1) // m) * m


def _pick_tile(m, unit, cap):
    """Largest t <= cap with t % unit == 0 and m % t == 0, else None."""
    best = None
    upper = min(cap, m)
    for t in range(unit, upper + 1, unit):
        if m % t == 0:
            best = t
    return best


def _pick_band(hp, wp, c2):
    """Output-row band height: largest divisor of hp whose packed bf16 conv
    input band (2*TH rows of wp x c2) stays under ~1 MiB."""
    row_bytes = wp * c2 * 2
    max_rows = max(2, (1 * 1024 * 1024) // max(1, row_bytes))
    th = 1
    for cand in range(1, hp + 1):
        if hp % cand == 0 and 2 * cand <= max_rows:
            th = cand
    return th


# ---------------------------------------------------------------------------
# Pass 1: conv-as-matmul.  LHS rows hold TWO consecutive conv pixels' patches
# (294 = 2*147 wide); the weight is block-diagonal (294, 128), so the MXU
# directly produces the lane-dense packed layout  lanes[0:64] = even column,
# lanes[64:128] = odd column.  BN partial sums / sums-of-squares are emitted
# in the same pass (f32), the conv output is stored in bf16.
# ---------------------------------------------------------------------------
def _conv_stats_kernel(p_ref, w_ref, y_ref, sum_ref, ssq_ref):
    # p_ref: (TM2, 294) bf16   w_ref: (294, 128) bf16   y_ref: (TM2, 128) bf16
    # sum_ref / ssq_ref: (8, 128) f32 per-tile partials (reduced in glue)
    y = jnp.dot(p_ref[...], w_ref[...], preferred_element_type=jnp.float32)
    y_ref[...] = y.astype(jnp.bfloat16)
    tm2, c2 = y.shape
    y3 = y.reshape(tm2 // 8, 8, c2)           # major-dim split, no lane move
    sum_ref[...] = jnp.sum(y3, axis=0)        # (8, 128) partial sum
    ssq_ref[...] = jnp.sum(y3 * y3, axis=0)   # (8, 128) partial sum of squares


# ---------------------------------------------------------------------------
# Pass 2: fused BN affine + ReLU + MaxPool2d(3, 2, 1), one (image, row-band)
# per grid step.  Input is the packed conv output (N, Ho, Wp, 128); a 2-row
# halo block supplies the conv row just above the band for the top pool tap.
# ---------------------------------------------------------------------------
def _bn_relu_pool_kernel(y_ref, halo_ref, scale_ref, shift_ref, o_ref):
    _, _, wp, c2 = y_ref.shape
    c = c2 // 2
    th = o_ref.shape[1]

    scale = scale_ref[...]                    # (1, 2C) f32
    shift = shift_ref[...]

    # BN affine + ReLU (f32 math; v5e has no bf16 VPU).
    y = y_ref[0].astype(jnp.float32)                            # (2*TH, Wp, 2C)
    r = jnp.maximum(y * scale + shift, 0.0)

    a = r[:, :, :c]                           # conv column w = 2u
    b = r[:, :, c:]                           # conv column w = 2u + 1

    # Column w = 2u - 1: roll odd columns by one packed column (XLU) and
    # zero-fill u == 0.  Zero reproduces the -inf pool pad because everything
    # is >= 0 after ReLU.
    col = lax.broadcasted_iota(jnp.int32, b.shape, 1)
    b_prev = jnp.where(col == 0, 0.0, pltpu.roll(b, shift=1, axis=1))

    hm = jnp.maximum(jnp.maximum(a, b), b_prev)                 # (2*TH, Wp, C)

    # Vertical 3-max, stride 2: rows 2t-1, 2t, 2t+1 (band-local t).
    hm2 = hm.reshape(th, 2, wp, c)            # split major dim, no data move
    even = hm2[:, 0]                          # band-local conv rows 2t
    odd = hm2[:, 1]                           # band-local conv rows 2t + 1
    m01 = jnp.maximum(even, odd)

    # Top tap for the band's first output row: conv row just above the band
    # (row 1 of the 2-row halo block), or the zero pool pad for band 0.
    yh = halo_ref[0, 1].astype(jnp.float32)                     # (Wp, 2C)
    rh = jnp.maximum(yh * scale + shift, 0.0)
    ah = rh[:, :c]
    bh = rh[:, c:]
    colh = lax.broadcasted_iota(jnp.int32, bh.shape, 0)
    bh_prev = jnp.where(colh == 0, 0.0, pltpu.roll(bh, shift=1, axis=0))
    hm_top = jnp.maximum(jnp.maximum(ah, bh), bh_prev)          # (Wp, C)
    hm_top = jnp.where(pl.program_id(1) == 0, 0.0, hm_top)

    o_ref[0, 0] = jnp.maximum(m01[0], hm_top)
    if th > 1:
        o_ref[0, pl.ds(1, th - 1)] = jnp.maximum(m01[1:], odd[:th - 1])


# ---------------------------------------------------------------------------
# Glue helpers
# ---------------------------------------------------------------------------
def _im2col(x_nhwc, k, stride, pad):
    """Extract conv patches -> [N*Ho*Wo, k*k*C]; row order matches OIHW->HWIO weight."""
    N, H, W, C = x_nhwc.shape
    xp = jnp.pad(x_nhwc, ((0, 0), (pad, pad), (pad, pad), (0, 0)))
    Ho = (H + 2 * pad - k) // stride + 1
    Wo = (W + 2 * pad - k) // stride + 1
    pieces = []
    for dy in range(k):
        for dx in range(k):
            pieces.append(
                xp[:, dy:dy + stride * (Ho - 1) + 1:stride,
                      dx:dx + stride * (Wo - 1) + 1:stride, :])
    patches = jnp.stack(pieces, axis=-2)                  # [N, Ho, Wo, k*k, C]
    return patches.reshape(N * Ho * Wo, k * k * C), (N, Ho, Wo)


@jax.jit
def resnet_front_forward(x_nchw, w_oihw, conv_b, bn_gamma, bn_beta):
    """x_nchw: [N, 3, H, W] f32 -> [N, 64, H//4, W//4] f32."""
    # conv bias before train-mode BatchNorm is cancelled exactly by the mean
    # subtraction, so it is not used (accepted only for API fidelity).
    del conv_b
    Cout, Cin, kh, kw = w_oihw.shape
    stride, pad = 2, 3

    # ---- glue: NCHW -> NHWC (bf16), im2col in bf16 ---------------------------
    x_nhwc = jnp.transpose(x_nchw, (0, 2, 3, 1)).astype(jnp.bfloat16)
    patches, (N, Ho, Wo) = _im2col(x_nhwc, kh, stride, pad)        # bf16 [M, 147]
    assert Ho % 2 == 0 and Wo % 2 == 0, "stem expects even conv-output H/W"
    K = kh * kw * Cin                                              # 147
    M = N * Ho * Wo
    Hp, Wp = Ho // 2, Wo // 2
    M2 = M // 2
    K2 = 2 * K                                                     # 294 (unpadded)
    C2 = 2 * Cout                                                  # 128

    # Free row-major reinterpretation: each row holds two consecutive pixels'
    # patches (even column then odd column of the same conv row).
    patches2 = patches.reshape(M2, K2)

    # Block-diagonal weight: [W 0; 0 W] -> (294, 128) bf16 (stays VMEM-resident).
    w_mat = jnp.transpose(w_oihw, (2, 3, 1, 0)).reshape(K, Cout)
    wz = jnp.zeros_like(w_mat)
    w2 = jnp.concatenate(
        [jnp.concatenate([w_mat, wz], axis=1),
         jnp.concatenate([wz, w_mat], axis=1)], axis=0).astype(jnp.bfloat16)

    # ---- tile selection: exact divisor of M2 (no pad / slice copies) ---------
    TM2 = _pick_tile(M2, 16, 2048)
    if TM2 is None:
        TM2 = _pick_tile(M2, 8, 2048)
    if TM2 is None:
        # Fallback only for degenerate shapes: padded rows are zero -> they
        # contribute 0 to the BN partials and are sliced off before pass 2.
        TM2 = min(2048, _round_up(M2, 8))
        M2_pad = _round_up(M2, TM2)
        patches2 = jnp.pad(patches2, ((0, M2_pad - M2), (0, 0)))
    else:
        M2_pad = M2
    n_tiles = M2_pad // TM2

    cparams1 = pltpu.CompilerParams(
        dimension_semantics=("parallel",),          # megacore-shardable
        vmem_limit_bytes=32 * 1024 * 1024,          # explicit (v5e default 16 MiB)
    )

    # ---- Pallas pass 1: packed conv matmul + BN partial stats ----------------
    cost1 = pl.CostEstimate(
        flops=2 * M2_pad * K2 * C2,
        transcendentals=0,
        bytes_accessed=(M2_pad * K2 * 2 + K2 * C2 * 2
                        + M2_pad * C2 * 2 + 2 * n_tiles * 8 * C2 * 4),
    )
    y_flat, psum, pssq = pl.pallas_call(
        _conv_stats_kernel,
        out_shape=(
            jax.ShapeDtypeStruct((M2_pad, C2), jnp.bfloat16),
            jax.ShapeDtypeStruct((n_tiles * 8, C2), jnp.float32),
            jax.ShapeDtypeStruct((n_tiles * 8, C2), jnp.float32),
        ),
        grid=(n_tiles,),
        in_specs=[
            pl.BlockSpec((TM2, K2), lambda i: (i, 0)),
            pl.BlockSpec((K2, C2), lambda i: (0, 0)),   # weight stays resident
        ],
        out_specs=(
            pl.BlockSpec((TM2, C2), lambda i: (i, 0)),
            pl.BlockSpec((8, C2), lambda i: (i, 0)),
            pl.BlockSpec((8, C2), lambda i: (i, 0)),
        ),
        compiler_params=cparams1,
        cost_estimate=cost1,
    )(patches2, w2)

    # ---- glue: finalize global BN stats (tiny reduction) ---------------------
    # NOTE: var via E[y^2]-mu^2 in f32; acceptable here, clamp guards cancellation.
    s = jnp.sum(psum, axis=0)
    q = jnp.sum(pssq, axis=0)
    s64 = s[:Cout] + s[Cout:]
    q64 = q[:Cout] + q[Cout:]
    inv_m = 1.0 / jnp.float32(M)
    mu = s64 * inv_m
    var = jnp.maximum(q64 * inv_m - mu * mu, 0.0)
    inv_std = lax.rsqrt(var + EPS)
    scale = bn_gamma * inv_std
    shift = bn_beta - mu * scale
    scale2 = jnp.concatenate([scale, scale]).reshape(1, C2)   # packed x2
    shift2 = jnp.concatenate([shift, shift]).reshape(1, C2)

    # ---- glue: free view to (N, Ho, Wp, 128) packed layout -------------------
    if M2_pad != M2:
        y_flat = y_flat[:M2]
    y4 = y_flat.reshape(N, Ho, Wp, C2)

    # ---- Pallas pass 2: fused BN affine + ReLU + 3x3/s2 max-pool, row bands --
    TH = _pick_band(Hp, Wp, C2)                 # output rows per band
    n_bands = Hp // TH

    cost2 = pl.CostEstimate(
        flops=6 * M * Cout,
        transcendentals=0,
        bytes_accessed=(M2 * C2 * 2 + N * n_bands * 2 * Wp * C2 * 2
                        + N * Hp * Wp * Cout * 4 + 2 * C2 * 4),
    )
    cparams2 = pltpu.CompilerParams(
        dimension_semantics=("parallel", "parallel"),
        vmem_limit_bytes=32 * 1024 * 1024,
    )
    pooled = pl.pallas_call(
        _bn_relu_pool_kernel,
        out_shape=jax.ShapeDtypeStruct((N, Hp, Wp, Cout), jnp.float32),
        grid=(N, n_bands),
        in_specs=[
            pl.BlockSpec((1, 2 * TH, Wp, C2), lambda n, b: (n, b, 0, 0)),
            # 2-conv-row halo block whose second row is the conv row just above
            # the band (clamped to block 0 for the first band, where it is
            # discarded in-kernel in favour of the zero pool pad).
            pl.BlockSpec((1, 2, Wp, C2),
                         lambda n, b: (n, jnp.maximum(b * TH - 1, 0), 0, 0)),
            pl.BlockSpec((1, C2), lambda n, b: (0, 0)),
            pl.BlockSpec((1, C2), lambda n, b: (0, 0)),
        ],
        out_specs=pl.BlockSpec((1, TH, Wp, Cout), lambda n, b: (n, b, 0, 0)),
        compiler_params=cparams2,
        cost_estimate=cost2,
    )(y4, y4, scale2, shift2)

    return jnp.transpose(pooled, (0, 3, 1, 2))             # back to NCHW


# ---------------------------------------------------------------------------
# Pure-JAX reference: conv(+bias) -> BN(train) -> ReLU -> MaxPool(3,2,1)
# ---------------------------------------------------------------------------
def _reference(x_nchw, w_oihw, conv_b, bn_gamma, bn_beta, matmul_dtype=jnp.float32):
    y = lax.conv_general_dilated(
        x_nchw.astype(matmul_dtype), w_oihw.astype(matmul_dtype),
        window_strides=(2, 2), padding=((3, 3), (3, 3)),
        dimension_numbers=("NCHW", "OIHW", "NCHW"),
        preferred_element_type=jnp.float32)
    y = y + conv_b[None, :, None, None]
    mu = jnp.mean(y, axis=(0, 2, 3), keepdims=True)
    var = jnp.mean((y - mu) ** 2, axis=(0, 2, 3), keepdims=True)
    y = (y - mu) / jnp.sqrt(var + EPS)
    y = y * bn_gamma[None, :, None, None] + bn_beta[None, :, None, None]
    y = jnp.maximum(y, 0.0)
    y = lax.reduce_window(
        y, -jnp.inf, lax.max,
        window_dimensions=(1, 1, 3, 3), window_strides=(1, 1, 2, 2),
        padding=((0, 0), (0, 0), (1, 1), (1, 1)))
    return y


if __name__ == "__main__":
    key = jax.random.PRNGKey(0)
    k_x, k_w, k_b, k_g, k_bb = jax.random.split(key, 5)

    # Small input consistent with Conv2d(3, 64, 7, 2, 3): NCHW [2, 3, 16, 16]
    x = jax.random.normal(k_x, (2, 3, 16, 16), dtype=jnp.float32)
    conv_w = 0.05 * jax.random.normal(k_w, (64, 3, 7, 7), dtype=jnp.float32)
    conv_b = 0.05 * jax.random.normal(k_b, (64,), dtype=jnp.float32)
    bn_gamma = 1.0 + 0.1 * jax.random.normal(k_g, (64,), dtype=jnp.float32)
    bn_beta = 0.1 * jax.random.normal(k_bb, (64,), dtype=jnp.float32)

    out = jax.block_until_ready(resnet_front_forward(x, conv_w, conv_b, bn_gamma, bn_beta))
    assert out.shape == (2, 64, 4, 4), out.shape

    # Check vs a reference using the same bf16 MXU-operand precision
    # (tolerance widened slightly because the inter-pass conv output is bf16).
    ref_bf = jax.block_until_ready(
        _reference(x, conv_w, conv_b, bn_gamma, bn_beta, matmul_dtype=jnp.bfloat16))
    err_bf = float(jnp.max(jnp.abs(out - ref_bf)))
    assert jnp.allclose(out, ref_bf, atol=3e-2, rtol=3e-2), err_bf

    # Loose check vs the pure-f32 (PyTorch-equivalent) reference.
    ref_f32 = jax.block_until_ready(
        _reference(x, conv_w, conv_b, bn_gamma, bn_beta, matmul_dtype=jnp.float32))
    err_f32 = float(jnp.max(jnp.abs(out - ref_f32)))
    assert jnp.allclose(out, ref_f32, atol=8e-2, rtol=8e-2), err_f32

    print("KERNEL_OK")
</pallas_src>

<mosaic_0001>
module attributes {stable_mosaic.version = 11 : i64} {
  func.func @_conv_stats_kernel(%arg0: i32, %arg1: memref<64x294xbf16, #tpu.memory_space<vmem>>, %arg2: memref<294x128xbf16, #tpu.memory_space<vmem>>, %arg3: memref<64x128xbf16, #tpu.memory_space<vmem>>, %arg4: memref<8x128xf32, #tpu.memory_space<vmem>>, %arg5: memref<8x128xf32, #tpu.memory_space<vmem>>) attributes {dimension_semantics = [#tpu.dimension_semantics<parallel>], iteration_bounds = array<i64: 1>, scalar_prefetch = 0 : i64, scratch_operands = 0 : i64, tpu.core_type = #tpu.core_type<tc>, window_params = [{transform_indices = @transform_0, window_bounds = array<i64: 64, 294>}, {pipeline_mode = #tpu.pipeline_mode<synchronous>, transform_indices = @transform_1, window_bounds = array<i64: 294, 128>}, {transform_indices = @transform_2, window_bounds = array<i64: 64, 128>}, {transform_indices = @transform_3, window_bounds = array<i64: 8, 128>}, {transform_indices = @transform_4, window_bounds = array<i64: 8, 128>}]} {
    %c0 = arith.constant 0 : index
    %c0_0 = arith.constant 0 : index
    %0 = vector.load %arg1[%c0, %c0_0] : memref<64x294xbf16, #tpu.memory_space<vmem>>, vector<64x294xbf16>
    %c0_1 = arith.constant 0 : index
    %c0_2 = arith.constant 0 : index
    %1 = vector.load %arg2[%c0_1, %c0_2] : memref<294x128xbf16, #tpu.memory_space<vmem>>, vector<294x128xbf16>
    %cst = arith.constant dense<0.000000e+00> : vector<64x128xf32>
    %2 = tpu.matmul %0, %1, %cst {dimension_numbers = #tpu.dot_dimension_numbers<[1], [0], [0], [1], [0, 0, 1, 1], [], []>} : vector<64x294xbf16>, vector<294x128xbf16>, vector<64x128xf32> -> vector<64x128xf32>
    %3 = arith.truncf %2 : vector<64x128xf32> to vector<64x128xbf16>
    %c0_3 = arith.constant 0 : index
    %c0_4 = arith.constant 0 : index
    %4 = vector.load %arg3[%c0_3, %c0_4] : memref<64x128xbf16, #tpu.memory_space<vmem>>, vector<64x128xbf16>
    tpu.vector_store %arg3[%c0_3, %c0_4], %3 {strides = array<i32>} : memref<64x128xbf16, #tpu.memory_space<vmem>>, vector<64x128xbf16>,
    %5 = vector.shape_cast %2 : vector<64x128xf32> to vector<8x8x128xf32>
    %cst_5 = arith.constant dense<0.000000e+00> : vector<8x128xf32>
    %6 = vector.multi_reduction <add>, %5, %cst_5 [0] : vector<8x8x128xf32> to vector<8x128xf32>
    %c0_6 = arith.constant 0 : index
    %c0_7 = arith.constant 0 : index
    %7 = vector.load %arg4[%c0_6, %c0_7] : memref<8x128xf32, #tpu.memory_space<vmem>>, vector<8x128xf32>
    tpu.vector_store %arg4[%c0_6, %c0_7], %6 {strides = array<i32>} : memref<8x128xf32, #tpu.memory_space<vmem>>, vector<8x128xf32>,
    %8 = arith.mulf %5, %5 : vector<8x8x128xf32>
    %cst_8 = arith.constant dense<0.000000e+00> : vector<8x128xf32>
    %9 = vector.multi_reduction <add>, %8, %cst_8 [0] : vector<8x8x128xf32> to vector<8x128xf32>
    %c0_9 = arith.constant 0 : index
    %c0_10 = arith.constant 0 : index
    %10 = vector.load %arg5[%c0_9, %c0_10] : memref<8x128xf32, #tpu.memory_space<vmem>>, vector<8x128xf32>
    tpu.vector_store %arg5[%c0_9, %c0_10], %9 {strides = array<i32>} : memref<8x128xf32, #tpu.memory_space<vmem>>, vector<8x128xf32>,
    return
  }
  func.func @transform_0(%arg0: i32) -> (i32, i32) {
    %c0_i32 = arith.constant 0 : i32
    %c0_i32_0 = arith.constant 0 : i32
    return %arg0, %c0_i32 : i32, i32
  }
  func.func @transform_1(%arg0: i32) -> (i32, i32) {
    %c0_i32 = arith.constant 0 : i32
    %c0_i32_0 = arith.constant 0 : i32
    %c0_i32_1 = arith.constant 0 : i32
    return %c0_i32, %c0_i32_0 : i32, i32
  }
  func.func @transform_2(%arg0: i32) -> (i32, i32) {
    %c0_i32 = arith.constant 0 : i32
    %c0_i32_0 = arith.constant 0 : i32
    return %arg0, %c0_i32 : i32, i32
  }
  func.func @transform_3(%arg0: i32) -> (i32, i32) {
    %c0_i32 = arith.constant 0 : i32
    %c0_i32_0 = arith.constant 0 : i32
    return %arg0, %c0_i32 : i32, i32
  }
  func.func @transform_4(%arg0: i32) -> (i32, i32) {
    %c0_i32 = arith.constant 0 : i32
    %c0_i32_0 = arith.constant 0 : i32
    return %arg0, %c0_i32 : i32, i32
  }
}

module attributes {stable_mosaic.version = 11 : i64} {
  func.func @_bn_relu_pool_kernel(%arg0: i32, %arg1: i32, %arg2: memref<1x8x4x128xbf16, #tpu.memory_space<vmem>>, %arg3: memref<1x2x4x128xbf16, #tpu.memory_space<vmem>>, %arg4: memref<1x128xf32, #tpu.memory_space<vmem>>, %arg5: memref<1x128xf32, #tpu.memory_space<vmem>>, %arg6: memref<1x4x4x64xf32, #tpu.memory_space<vmem>>) attributes {dimension_semantics = [#tpu.dimension_semantics<parallel>, #tpu.dimension_semantics<parallel>], iteration_bounds = array<i64: 2, 1>, scalar_prefetch = 0 : i64, scratch_operands = 0 : i64, tpu.core_type = #tpu.core_type<tc>, window_params = [{transform_indices = @transform_0, window_bounds = array<i64: 1, 8, 4, 128>}, {transform_indices = @transform_1, window_bounds = array<i64: 1, 2, 4, 128>}, {pipeline_mode = #tpu.pipeline_mode<synchronous>, transform_indices = @transform_2, window_bounds = array<i64: 1, 128>}, {pipeline_mode = #tpu.pipeline_mode<synchronous>, transform_indices = @transform_3, window_bounds = array<i64: 1, 128>}, {transform_indices = @transform_4, window_bounds = array<i64: 1, 4, 4, 64>}]} {
    %c0 = arith.constant 0 : index
    %c0_0 = arith.constant 0 : index
    %0 = vector.load %arg4[%c0, %c0_0] : memref<1x128xf32, #tpu.memory_space<vmem>>, vector<1x128xf32>
    %c0_1 = arith.constant 0 : index
    %c0_2 = arith.constant 0 : index
    %1 = vector.load %arg5[%c0_1, %c0_2] : memref<1x128xf32, #tpu.memory_space<vmem>>, vector<1x128xf32>
    %c0_3 = arith.constant 0 : index
    %c0_4 = arith.constant 0 : index
    %c0_5 = arith.constant 0 : index
    %c0_6 = arith.constant 0 : index
    %2 = vector.load %arg2[%c0_3, %c0_4, %c0_5, %c0_6] : memref<1x8x4x128xbf16, #tpu.memory_space<vmem>>, vector<1x8x4x128xbf16>
    %3 = vector.shape_cast %2 : vector<1x8x4x128xbf16> to vector<8x4x128xbf16>
    %4 = arith.extf %3 : vector<8x4x128xbf16> to vector<8x4x128xf32>
    %5 = vector.shape_cast %0 : vector<1x128xf32> to vector<1x1x128xf32>
    %6 = vector.broadcast %5 : vector<1x1x128xf32> to vector<8x4x128xf32>
    %7 = arith.mulf %4, %6 : vector<8x4x128xf32>
    %8 = vector.shape_cast %1 : vector<1x128xf32> to vector<1x1x128xf32>
    %9 = vector.broadcast %8 : vector<1x1x128xf32> to vector<8x4x128xf32>
    %10 = arith.addf %7, %9 : vector<8x4x128xf32>
    %cst = arith.constant 0.000000e+00 : f32
    %11 = vector.broadcast %cst : f32 to vector<8x4x128xf32>
    %12 = arith.maximumf %10, %11 : vector<8x4x128xf32>
    %13 = vector.extract_strided_slice %12 {offsets = [0, 0, 0], sizes = [8, 4, 64], strides = [1, 1, 1]} : vector<8x4x128xf32> to vector<8x4x64xf32>
    %14 = vector.extract_strided_slice %12 {offsets = [0, 0, 64], sizes = [8, 4, 64], strides = [1, 1, 1]} : vector<8x4x128xf32> to vector<8x4x64xf32>
    %15 = tpu.iota {dimensions = array<i32: 1>} : vector<8x4x64xi32>
    %c0_i32 = arith.constant 0 : i32
    %16 = vector.broadcast %c0_i32 : i32 to vector<8x4x64xi32>
    %17 = arith.cmpi eq, %15, %16 : vector<8x4x64xi32>
    %c1_i32 = arith.constant 1 : i32
    %18 = tpu.dynamic_rotate %14 by %c1_i32 dim 1 : vector<8x4x64xf32>, i32 -> vector<8x4x64xf32>
    %cst_7 = arith.constant 0.000000e+00 : f32
    %19 = vector.broadcast %cst_7 : f32 to vector<8x4x64xf32>
    %20 = arith.select %17, %19, %18 : vector<8x4x64xi1>, vector<8x4x64xf32>
    %21 = arith.maximumf %13, %14 : vector<8x4x64xf32>
    %22 = arith.maximumf %21, %20 : vector<8x4x64xf32>
    %23 = vector.shape_cast %22 : vector<8x4x64xf32> to vector<4x2x4x64xf32>
    %24 = vector.extract_strided_slice %23 {offsets = [0, 0, 0, 0], sizes = [4, 1, 4, 64], strides = [1, 1, 1, 1]} : vector<4x2x4x64xf32> to vector<4x1x4x64xf32>
    %25 = vector.shape_cast %24 : vector<4x1x4x64xf32> to vector<4x4x64xf32>
    %26 = vector.extract_strided_slice %23 {offsets = [0, 1, 0, 0], sizes = [4, 1, 4, 64], strides = [1, 1, 1, 1]} : vector<4x2x4x64xf32> to vector<4x1x4x64xf32>
    %27 = vector.shape_cast %26 : vector<4x1x4x64xf32> to vector<4x4x64xf32>
    %28 = arith.maximumf %25, %27 : vector<4x4x64xf32>
    %c0_8 = arith.constant 0 : index
    %c1 = arith.constant 1 : index
    %c0_9 = arith.constant 0 : index
    %c0_10 = arith.constant 0 : index
    %29 = vector.load %arg3[%c0_8, %c1, %c0_9, %c0_10] : memref<1x2x4x128xbf16, #tpu.memory_space<vmem>>, vector<1x1x4x128xbf16>
    %30 = vector.shape_cast %29 : vector<1x1x4x128xbf16> to vector<4x128xbf16>
    %31 = arith.extf %30 : vector<4x128xbf16> to vector<4x128xf32>
    %32 = vector.broadcast %0 : vector<1x128xf32> to vector<4x128xf32>
    %33 = arith.mulf %31, %32 : vector<4x128xf32>
    %34 = vector.broadcast %1 : vector<1x128xf32> to vector<4x128xf32>
    %35 = arith.addf %33, %34 : vector<4x128xf32>
    %cst_11 = arith.constant 0.000000e+00 : f32
    %36 = vector.broadcast %cst_11 : f32 to vector<4x128xf32>
    %37 = arith.maximumf %35, %36 : vector<4x128xf32>
    %38 = vector.extract_strided_slice %37 {offsets = [0, 0], sizes = [4, 64], strides = [1, 1]} : vector<4x128xf32> to vector<4x64xf32>
    %39 = vector.extract_strided_slice %37 {offsets = [0, 64], sizes = [4, 64], strides = [1, 1]} : vector<4x128xf32> to vector<4x64xf32>
    %40 = tpu.iota {dimensions = array<i32: 0>} : vector<4x64xi32>
    %c0_i32_12 = arith.constant 0 : i32
    %41 = vector.broadcast %c0_i32_12 : i32 to vector<4x64xi32>
    %42 = arith.cmpi eq, %40, %41 : vector<4x64xi32>
    %c1_i32_13 = arith.constant 1 : i32
    %43 = tpu.dynamic_rotate %39 by %c1_i32_13 dim 0 : vector<4x64xf32>, i32 -> vector<4x64xf32>
    %cst_14 = arith.constant 0.000000e+00 : f32
    %44 = vector.broadcast %cst_14 : f32 to vector<4x64xf32>
    %45 = arith.select %42, %44, %43 : vector<4x64xi1>, vector<4x64xf32>
    %46 = arith.maximumf %38, %39 : vector<4x64xf32>
    %47 = arith.maximumf %46, %45 : vector<4x64xf32>
    %c0_i32_15 = arith.constant 0 : i32
    %48 = arith.cmpi eq, %arg1, %c0_i32_15 : i32
    %cst_16 = arith.constant 0.000000e+00 : f32
    %49 = vector.broadcast %cst_16 : f32 to vector<4x64xf32>
    %50 = arith.select %48, %49, %47 : vector<4x64xf32>
    %51 = vector.extract_strided_slice %28 {offsets = [0, 0, 0], sizes = [1, 4, 64], strides = [1, 1, 1]} : vector<4x4x64xf32> to vector<1x4x64xf32>
    %52 = vector.shape_cast %51 : vector<1x4x64xf32> to vector<4x64xf32>
    %53 = arith.maximumf %52, %50 : vector<4x64xf32>
    %c0_17 = arith.constant 0 : index
    %c0_18 = arith.constant 0 : index
    %c0_19 = arith.constant 0 : index
    %c0_20 = arith.constant 0 : index
    %54 = vector.load %arg6[%c0_17, %c0_18, %c0_19, %c0_20] : memref<1x4x4x64xf32, #tpu.memory_space<vmem>>, vector<1x1x4x64xf32>
    %55 = vector.shape_cast %54 : vector<1x1x4x64xf32> to vector<4x64xf32>
    %56 = vector.shape_cast %53 : vector<4x64xf32> to vector<1x1x4x64xf32>
    tpu.vector_store %arg6[%c0_17, %c0_18, %c0_19, %c0_20], %56 {strides = array<i32>} : memref<1x4x4x64xf32, #tpu.memory_space<vmem>>, vector<1x1x4x64xf32>,
    %57 = vector.extract_strided_slice %28 {offsets = [1, 0, 0], sizes = [3, 4, 64], strides = [1, 1, 1]} : vector<4x4x64xf32> to vector<3x4x64xf32>
    %58 = vector.extract_strided_slice %27 {offsets = [0, 0, 0], sizes = [3, 4, 64], strides = [1, 1, 1]} : vector<4x4x64xf32> to vector<3x4x64xf32>
    %59 = arith.maximumf %57, %58 : vector<3x4x64xf32>
    %c0_21 = arith.constant 0 : index
    %c1_22 = arith.constant 1 : index
    %c0_23 = arith.constant 0 : index
    %c0_24 = arith.constant 0 : index
    %60 = vector.load %arg6[%c0_21, %c1_22, %c0_23, %c0_24] : memref<1x4x4x64xf32, #tpu.memory_space<vmem>>, vector<1x3x4x64xf32>
    %61 = vector.shape_cast %60 : vector<1x3x4x64xf32> to vector<3x4x64xf32>
    %62 = vector.shape_cast %59 : vector<3x4x64xf32> to vector<1x3x4x64xf32>
    tpu.vector_store %arg6[%c0_21, %c1_22, %c0_23, %c0_24], %62 {strides = array<i32>} : memref<1x4x4x64xf32, #tpu.memory_space<vmem>>, vector<1x3x4x64xf32>,
    return
  }
  func.func @transform_0(%arg0: i32, %arg1: i32) -> (i32, i32, i32, i32) {
    %c0_i32 = arith.constant 0 : i32
    %c0_i32_0 = arith.constant 0 : i32
    %c0_i32_1 = arith.constant 0 : i32
    return %arg0, %arg1, %c0_i32, %c0_i32_0 : i32, i32, i32, i32
  }
  func.func @transform_1(%arg0: i32, %arg1: i32) -> (i32, i32, i32, i32) {
    %c4_i32 = arith.constant 4 : i32
    %0 = arith.muli %arg1, %c4_i32 : i32
    %c1_i32 = arith.constant 1 : i32
    %1 = arith.subi %0, %c1_i32 : i32
    %c0_i32 = arith.constant 0 : i32
    %2 = arith.maxsi %1, %c0_i32 : i32
    %c0_i32_0 = arith.constant 0 : i32
    %c0_i32_1 = arith.constant 0 : i32
    %c0_i32_2 = arith.constant 0 : i32
    return %arg0, %2, %c0_i32_0, %c0_i32_1 : i32, i32, i32, i32
  }
  func.func @transform_2(%arg0: i32, %arg1: i32) -> (i32, i32) {
    %c0_i32 = arith.constant 0 : i32
    %c0_i32_0 = arith.constant 0 : i32
    %c0_i32_1 = arith.constant 0 : i32
    return %c0_i32, %c0_i32_0 : i32, i32
  }
  func.func @transform_3(%arg0: i32, %arg1: i32) -> (i32, i32) {
    %c0_i32 = arith.constant 0 : i32
    %c0_i32_0 = arith.constant 0 : i32
    %c0_i32_1 = arith.constant 0 : i32
    return %c0_i32, %c0_i32_0 : i32, i32
  }
  func.func @transform_4(%arg0: i32, %arg1: i32) -> (i32, i32, i32, i32) {
    %c0_i32 = arith.constant 0 : i32
    %c0_i32_0 = arith.constant 0 : i32
    %c0_i32_1 = arith.constant 0 : i32
    return %arg0, %arg1, %c0_i32, %c0_i32_0 : i32, i32, i32, i32
  }
}

</mosaic_0001>

<bundles_post_ra>
// kernel: resnet_front_forward.2
= control target key start
LH: loop header
LB: loop body
LE: loop exit
PB: predicated region body
PF: predicated region fallthrough
CT: control target
= control target key end

     0   :  { %vm252_vm0 = vcmask 1042432   ;;  %vm239_vm1 = vcmask 310272   ;;  %s768_s1 = inlined_call_operand.vmem [shape: bf16[294,128], index: 1, kind: input, shape index: {}]   ;;  %s769_s0 = inlined_call_operand.vmem [shape: bf16[64,294], index: 0, kind: input, shape index: {}]   ;;  %s770_s2 = inlined_call_operand.vmem [shape: bf16[64,128], index: 2, kind: output, shape index: {0}]   ;;  %s771_s3 = inlined_call_operand.vmem [shape: f32[8,128], index: 3, kind: output, shape index: {1}]   ;;  %s772_s4 = inlined_call_operand.vmem [shape: f32[8,128], index: 4, kind: output, shape index: {2}]  }
   0x1   :  { %v538_v0 = vld [vmem:[%s768_s1 + $0x38] sm:$0xff]  ;;  %v67_v2 = vld [vmem:[%s768_s1 + $0x90] sm:$0x7]  ;;  %v548_v8 = vld [vmem:[%s768_s1 + $0x88] sm:$0xff] }
   0x2   :  { %v619_v1 = vld [vmem:[%s768_s1 + $0x78] sm:$0xff]  ;;  %v201_v3 = vunpack.c.l.b16 %v67_v2  ;;  %256 = vmatpush.bf16.msra.mxu0 %v538_v0  ;;  %572 = vmatpush.bf16.msra.mxu3 %v538_v0  ;;  %v537_v4 = vld [vmem:[%s768_s1 + $0x30] sm:$0xff]  ;;  %v536_v9 = vld [vmem:[%s768_s1 + $0x28] sm:$0xff] }
   0x3   :  { %580 = vmatpush.bf16.msra.mxu1 %v619_v1  ;;  %v545_v6 = vld [vmem:[%s768_s1 + $0x70] sm:$0xff]  ;;  %v544_v10 = vld [vmem:[%s768_s1 + $0x68] sm:$0xff]  ;;  %v547_v11 = vld [vmem:[%s768_s1 + $0x80] sm:$0xff] }
   0x4   :  { %v220_v5 = vpack.c.b16 %v201_v3, %v201_v3  ;;  %v535_v12 = vld [vmem:[%s768_s1 + $0x20] sm:$0xff]  ;;  %v405_v13 = vld [vmem:[%s769_s0 + $0x8] sm:$0xf]  ;;  %v521_v14 = vld [vmem:[%s769_s0 + $0x10] sm:$0xf0] }
   0x5   :  { %v543_v15 = vld [vmem:[%s768_s1 + $0x60] sm:$0xff]  ;;  %v406_v16 = vor.u32 %v521_v14, %v405_v13  ;;  %v534_v17 = vld [vmem:[%s768_s1 + $0x18] sm:$0xff]  ;;  %v533_v19 = vld [vmem:[%s768_s1 + $0x10] sm:$0xff] }
   0x6   :  { %v254_v7 = vsel %vm252_vm0, %v220_v5, 0  ;;  %257 = vmatpush.bf16.msra.mxu0 %v537_v4  ;;  %573 = vmatpush.bf16.msra.mxu3 %v537_v4  ;;  %v542_v18 = vld [vmem:[%s768_s1 + $0x58] sm:$0xff]  ;;  %v541_v20 = vld [vmem:[%s768_s1 + $0x50] sm:$0xff]  ;;  %v532_v21 = vld [vmem:[%s768_s1 + $0x8] sm:$0xff] }
   0x7   :  { %319 = vmatpush.bf16.msra.mxu2 %v254_v7  ;;  %581 = vmatpush.bf16.msra.mxu1 %v545_v6  ;;  %v540_v22 = vld [vmem:[%s768_s1 + $0x48] sm:$0xff]  ;;  %v531_v23 = vld [vmem:[%s768_s1] sm:$0xff]  ;;  %v409_v28 = vld [vmem:[%s769_s0 + $0x18] sm:$0xf] }
   0x8   :  { %v417_v24 = vld [vmem:[%s769_s0 + $0x20] sm:$0xf]  ;;  %v524_v25 = vld [vmem:[%s769_s0 + $0x28] sm:$0xf0]  ;;  %v523_v29 = vld [vmem:[%s769_s0 + $0x20] sm:$0xf0] }
   0x9   :  { %v397_v26 = vld [vmem:[%s769_s0] sm:$0xf]  ;;  %v520_v27 = vld [vmem:[%s769_s0 + $0x8] sm:$0xf0]  ;;  %v522_v31 = vld [vmem:[%s769_s0 + $0x1c] sm:$0xf]  ;;  %v418_v33 = vor.u32 %v524_v25, %v417_v24  ;;  %v410_v35 = vor.u32 %v523_v29, %v409_v28 }
   0xa   :  { %258 = vmatpush.bf16.msra.mxu0 %v536_v9  ;;  %574 = vmatpush.bf16.msra.mxu3 %v536_v9  ;;  %v539_v30 = vld [vmem:[%s768_s1 + $0x40] sm:$0xff]  ;;  %v411_v32 = vld [vmem:[%s769_s0 + $0x24] sm:$0xf0]  ;;  %v398_v34 = vor.u32 %v520_v27, %v397_v26  ;;  %v429_v37 = vld [vmem:[%s769_s0 + $0x38] sm:$0xf] }
   0xb   :  { %320 = vmatpush.bf16.msra.mxu2 %v548_v8  ;;  %582 = vmatpush.bf16.msra.mxu1 %v544_v10  ;;  %v414_v36 = vor.u32 %v522_v31, %v411_v32  ;;  %v527_v38 = vld [vmem:[%s769_s0 + $0x40] sm:$0xf0]  ;;  %v421_v39 = vld [vmem:[%s769_s0 + $0x30] sm:$0xf]  ;;  %v526_v40 = vld [vmem:[%s769_s0 + $0x38] sm:$0xf0] }
   0xc   :  { %v525_v41 = vld [vmem:[%s769_s0 + $0x34] sm:$0xf]  ;;  %v423_v42 = vld [vmem:[%s769_s0 + $0x3c] sm:$0xf0]  ;;  %v430_v43 = vor.u32 %v527_v38, %v429_v37  ;;  %v422_v44 = vor.u32 %v526_v40, %v421_v39  ;;  %v519_v46 = vld [vmem:[%s769_s0 + $0x4] sm:$0xf] }
   0xd   :  { %v426_v45 = vor.u32 %v525_v41, %v423_v42  ;;  %v399_v47 = vld [vmem:[%s769_s0 + $0xc] sm:$0xf0]  ;;  %v530_v50 = vld [vmem:[%s769_s0 + $0x58] sm:$0xf0]  ;;  %v433_v51 = vld [vmem:[%s769_s0 + $0x48] sm:$0xf] }
   0xe   :  { %259 = vmatpush.bf16.msra.mxu0 %v535_v12  ;;  %575 = vmatpush.bf16.msra.mxu3 %v535_v12  ;;  %v402_v48 = vor.u32 %v519_v46, %v399_v47  ;;  %v441_v49 = vld [vmem:[%s769_s0 + $0x50] sm:$0xf]  ;;  %v529_v52 = vld [vmem:[%s769_s0 + $0x50] sm:$0xf0]  ;;  %v528_v53 = vld [vmem:[%s769_s0 + $0x4c] sm:$0xf] }
   0xf   :  { %321 = vmatpush.bf16.msra.mxu2 %v547_v11  ;;  %583 = vmatpush.bf16.msra.mxu1 %v543_v15  ;;  %v435_v54 = vld [vmem:[%s769_s0 + $0x54] sm:$0xf0]  ;;  %v442_v55 = vor.u32 %v530_v50, %v441_v49  ;;  %v434_v56 = vor.u32 %v529_v52, %v433_v51 }
  0x10   :  { %v438_v57 = vor.u32 %v528_v53, %v435_v54 }
  0x12   :  { %515 = vmatmul.msk.bf16.vlgmr.msra.gmra.mxu2 %vm239_vm1, %v406_v16  ;;  %260 = vmatpush.bf16.msra.mxu0 %v534_v17 }
  0x13   :  { %576 = vmatpush.bf16.msra.mxu3 %v534_v17  ;;  %584 = vmatpush.bf16.msra.mxu1 %v542_v18 }
  0x16   :  { %261 = vmatpush.bf16.msra.mxu0 %v533_v19 }
  0x17   :  { %577 = vmatpush.bf16.msra.mxu3 %v533_v19  ;;  %585 = vmatpush.bf16.msra.mxu1 %v541_v20 }
  0x1a   :  { %262 = vmatpush.bf16.msra.mxu0 %v532_v21 }
  0x1b   :  { %578 = vmatpush.bf16.msra.mxu3 %v532_v21  ;;  %586 = vmatpush.bf16.msra.mxu1 %v540_v22 }
  0x1e   :  { %263 = vmatpush.bf16.msra.mxu0 %v531_v23 }
  0x1f   :  { %579 = vmatpush.bf16.msra.mxu3 %v531_v23  ;;  %587 = vmatpush.bf16.msra.mxu1 %v539_v30 }
  0x21   :  { %264 = vmatmul.bf16.vlgmr.msra.gmra.mxu0 %v398_v34 }
  0x22   :  { %285 = vmatpush.bf16.msrb.mxu0 %v619_v1  ;;  %516 = vmatmul.msk.bf16.gmra.mxu2 %vm239_vm1, %v418_v33 }
  0x23   :  { %269 = vmatmul.bf16.vlgmr.msra.gmra.mxu3 %v410_v35  ;;  %298 = vmatmul.bf16.vlgmr.msra.gmra.mxu1 %v414_v36 }
  0x26   :  { %286 = vmatpush.bf16.msrb.mxu0 %v545_v6 }
  0x2a   :  { %287 = vmatpush.bf16.msrb.mxu0 %v544_v10 }
  0x2e   :  { %288 = vmatpush.bf16.msrb.mxu0 %v543_v15 }
  0x32   :  { %289 = vmatpush.bf16.msrb.mxu0 %v542_v18  ;;  %517 = vmatmul.msk.bf16.gmra.mxu2 %vm239_vm1, %v430_v43 }
  0x33   :  { %274 = vmatmul.bf16.gmra.mxu3 %v422_v44  ;;  %303 = vmatmul.bf16.gmra.mxu1 %v426_v45 }
  0x36   :  { %290 = vmatpush.bf16.msrb.mxu0 %v541_v20 }
  0x3a   :  { %291 = vmatpush.bf16.msrb.mxu0 %v540_v22 }
  0x3e   :  { %292 = vmatpush.bf16.msrb.mxu0 %v539_v30 }
  0x41   :  { %293 = vmatmul.bf16.vlgmr.msrb.gmra.mxu0 %v402_v48 }
  0x42   :  { %518 = vmatmul.msk.bf16.gmra.mxu2 %vm239_vm1, %v442_v55 }
  0x43   :  { %279 = vmatmul.bf16.gmra.mxu3 %v434_v56  ;;  %308 = vmatmul.bf16.gmra.mxu1 %v438_v57 }
  0x95   :  { %v323_v58 = vpop.f32.mrf.mxu2 }
  0x9d   :  { %v325_v59 = vpop.f32.mrf.mxu2 }
  0x9e   :  { %v265_v0 = vpop.f32.mrf.mxu0 }
  0xa0   :  { %v299_v60 = vpop.f32.mrf.mxu1 }
  0xa5   :  { %v328_v61 = vpop.f32.mrf.mxu2 }
  0xa6   :  { %v270_v62 = vpop.f32.mrf.mxu3  ;;  %v267_v9 = vpop.f32.mrf.mxu0 }
  0xa7   :  { %v300_v1 = vadd.f32 %v299_v60, %v270_v62 }
  0xa8   :  { %v301_v63 = vpop.f32.mrf.mxu1 }
  0xa9   :  { %v329_v5 = vadd.f32 %v328_v61, %v300_v1 }
  0xab   :  { %v369_v33 = vmul.f32 %v329_v5, %v329_v5 }
  0xad   :  { %v330_v2 = vpop.f32.mrf.mxu2 }
  0xae   :  { %v272_v3 = vpop.f32.mrf.mxu3 }
  0xaf   :  { %v302_v4 = vadd.f32 %v301_v63, %v272_v3 }
  0xb0   :  { %v304_v7 = vpop.f32.mrf.mxu1 }
  0xb1   :  { %v331_v6 = vadd.f32 %v330_v2, %v302_v4 }
  0xb3   :  { %v557_v8 = vpack.c.bf16 %v331_v6, %v329_v5  ;;  %v370_v37 = vmul.f32 %v331_v6, %v331_v6 }
  0xb5   :  { %569 = vst [vmem:[%s770_s2 + $0x8] sm:$0xff] %v557_v8   ;;  %v333_v10 = vpop.f32.mrf.mxu2 }
  0xb6   :  { %v275_v11 = vpop.f32.mrf.mxu3 }
  0xb7   :  { %v305_v14 = vadd.f32 %v304_v7, %v275_v11 }
  0xb8   :  { %v306_v12 = vpop.f32.mrf.mxu1 }
  0xb9   :  { %v334_v18 = vadd.f32 %v333_v10, %v305_v14 }
  0xbb   :  { %v371_v40 = vmul.f32 %v334_v18, %v334_v18 }
  0xbd   :  { %v335_v15 = vpop.f32.mrf.mxu2 }
  0xbe   :  { %v294_v13 = vpop.f32.mrf.mxu0  ;;  %v277_v16 = vpop.f32.mrf.mxu3 }
  0xbf   :  { %v307_v17 = vadd.f32 %v306_v12, %v277_v16  ;;  %v295_v19 = vadd.f32 %v294_v13, %v265_v0 }
  0xc0   :  { %v309_v22 = vpop.f32.mrf.mxu1 }
  0xc1   :  { %v336_v20 = vadd.f32 %v335_v15, %v307_v17  ;;  %v324_v24 = vadd.f32 %v323_v58, %v295_v19 }
  0xc3   :  { %v562_v21 = vpack.c.bf16 %v336_v20, %v334_v18  ;;  %v367_v29 = vmul.f32 %v324_v24, %v324_v24  ;;  %v372_v48 = vmul.f32 %v336_v20, %v336_v20 }
  0xc5   :  { %570 = vst [vmem:[%s770_s2 + $0x10] sm:$0xff] %v562_v21   ;;  %v338_v26 = vpop.f32.mrf.mxu2 }
  0xc6   :  { %v296_v23 = vpop.f32.mrf.mxu0  ;;  %v280_v27 = vpop.f32.mrf.mxu3 }
  0xc7   :  { %v297_v25 = vadd.f32 %v296_v23, %v267_v9  ;;  %v310_v36 = vadd.f32 %v309_v22, %v280_v27 }
  0xc8   :  { %v311_v41 = vpop.f32.mrf.mxu1 }
  0xc9   :  { %v326_v28 = vadd.f32 %v325_v59, %v297_v25  ;;  %v339_v44 = vadd.f32 %v338_v26, %v310_v36 }
  0xcb   :  { %v552_v30 = vpack.c.bf16 %v326_v28, %v324_v24  ;;  %v359_v31 = vadd.f32 %v326_v28, %v324_v24  ;;  %v368_v32 = vmul.f32 %v326_v28, %v326_v28  ;;  %v373_v53 = vmul.f32 %v339_v44, %v339_v44 }
  0xcd   :  { %553 = vst [vmem:[%s770_s2] sm:$0xff] %v552_v30   ;;  %v360_v34 = vadd.f32 %v359_v31, %v329_v5  ;;  %v375_v35 = vadd.f32 %v368_v32, %v367_v29  ;;  %v340_v47 = vpop.f32.mrf.mxu2 }
  0xce   :  { %v282_v42 = vpop.f32.mrf.mxu3 }
  0xcf   :  { %v361_v38 = vadd.f32 %v360_v34, %v331_v6  ;;  %v376_v39 = vadd.f32 %v375_v35, %v369_v33  ;;  %v312_v46 = vadd.f32 %v311_v41, %v282_v42 }
  0xd1   :  { %v377_v43 = vadd.f32 %v376_v39, %v370_v37  ;;  %v362_v45 = vadd.f32 %v361_v38, %v334_v18  ;;  %v341_v51 = vadd.f32 %v340_v47, %v312_v46 }
  0xd3   :  { %v363_v49 = vadd.f32 %v362_v45, %v336_v20  ;;  %v378_v50 = vadd.f32 %v377_v43, %v371_v40  ;;  %v567_v55 = vpack.c.bf16 %v341_v51, %v339_v44  ;;  %v374_v58 = vmul.f32 %v341_v51, %v341_v51 }
  0xd5   :  { %v364_v52 = vadd.f32 %v363_v49, %v339_v44  ;;  %v379_v54 = vadd.f32 %v378_v50, %v372_v48  ;;  %571 = vst [vmem:[%s770_s2 + $0x18] sm:$0xff] %v567_v55  }
  0xd7   :  { %v380_v56 = vadd.f32 %v379_v54, %v373_v53  ;;  %v365_v57 = vadd.f32 %v364_v52, %v341_v51 }
  0xd9   :  { %366 = vst [vmem:[%s771_s3] sm:$0xff] %v365_v57  ;;  %v381_v59 = vadd.f32 %v380_v56, %v374_v58 }
  0xdb   :  { %382 = vst [vmem:[%s772_s4] sm:$0xff] %v381_v59 }

// kernel: resnet_front_forward.3
= control target key start
LH: loop header
LB: loop body
LE: loop exit
PB: predicated region body
PF: predicated region fallthrough
CT: control target
= control target key end

     0   :  { %9 = vsyncpa [#allocation3], 0  ;;  %s1077_s0 = inlined_call_operand.vmem [shape: bf16[2,8,4,128], index: 0, kind: input, shape index: {}, may-alias: {0,1}]   ;;  %s1078_s1 = inlined_call_operand.vmem [shape: bf16[2,8,4,128], index: 1, kind: input, shape index: {}, may-alias: {0,1}]   ;;  %s1079_s2 = inlined_call_operand.vmem [shape: f32[1,128], index: 2, kind: input, shape index: {}]   ;;  %s1080_s3 = inlined_call_operand.vmem [shape: f32[1,128], index: 3, kind: input, shape index: {}]   ;;  %s1081_s4 = inlined_call_operand.hbm [shape: f32[2,4,4,64], index: 4, kind: output, shape index: {}]  }
   0x1   :  { %11 = vsyncpa [#allocation3 + $0x1], 0  ;;  %s845_s15 = smov 0   ;;  %s847_s16 = smov 0  }
   0x2   :  { %s849_s17 = smov 0   ;;  %s851_s18 = smov 0  }
   0x3   :  { %s853_s19 = smov 0   ;;  %s855_s20 = smov 0  }
   0x4 LB: > { %s657_s21 = sadd.s32 4294967295, %s816_s20   ;;  %s658_s22 = sadd.s32 4294967294, %s816_s20   ;;  %s816_s20 = sphi %s855_s20, %s17_s20   ;;  %s812_s19 = sphi %s853_s19, %s1088_s19   ;;  %s808_s18 = sphi %s851_s18, %s1087_s18   ;;  %s804_s17 = sphi %s849_s17, %s1086_s17   ;;  %s800_s16 = sphi %s847_s16, %s1085_s16   ;;  %s796_s15 = sphi %s845_s15, %s1084_s15  }
   0x5   : > { %s29_s23 = sadd.s32 1, %s812_s19  ;;  %s144_s24 = sadd.s32 1, %s804_s17 }
   0x6   : > { %p31_p0 = scmp.ge.s32.totalorder %s29_s23, 2  ;;  %p154_p1 = scmp.ne.s32.totalorder %s804_s17, %s800_s16 }
   0x7   : > { %p155_p2 = scmp.eq.s32.totalorder %s657_s21, 1  ;;  %p160_p3 = scmp.ne.s32.totalorder %s800_s16, %s796_s15 }
   0x8   : > { %s1090_s23 = smov (%p31_p0, %s29_s23), 0  ;;  %p161_p5 = scmp.eq.s32.totalorder %s658_s22, 1 }
   0x9   : > { %p885_p4 = por %p155_p2, %p154_p1  ;;  %s139_s26 = ssub.s32 %s812_s19, %s1090_s23 }
   0xa   : > { %p661_p6 = scmp.ge.s32.totalorder %s816_s20, 1  ;;  %p142_p7 = scmp.eq.s32.totalorder %s139_s26, 0 }
   0xb   : > { %p892_p8 = por %p161_p5, %p160_p3  ;;  %p219_p9 = scmp.lt.s32.totalorder %s816_s20, 3 }
   0xc   : > { %s898_s28 = scalar_select %p142_p7, %s804_s17, %s144_s24  }
   0xd   : > { %p220_p10 = pnand %p661_p6, %p219_p9 }
   0xe   : > { %p263_p11 = scmp.lt.s32.totalorder (!%p220_p10), %s808_s18, 1  ;;  %s818_s21 = smov (!%p220_p10), 64  }
   0xf   : > { %223 = sbr.rel (%p220_p10) target bundleno = 202 (0xca), region = 36  ;;  %s259_s22 = sand.u32 (!%p220_p10), 1, %s800_s16  }
  0x10   : > { %s662_s24 = sshll.u32 (!%p220_p10), %s259_s22, 4  ;;  %s543_s8 = scalar_lea.sflag (!%p220_p10), [#allocation3], %s259_s22 }
  0x11   : > { %s1012_s26 = scalar_lea.vmem (!%p220_p10), [#allocation2], %s662_s24  ;;  %s758_s13 = scalar_lea.hbm (!%p220_p10), %s1081_s4, 32 }
  0x14   : > { %s902_s29 = scalar_select %p263_p11, %s808_s18, 1  ;;  %v736_v0 = vld [vmem:[%s1079_s2] ss:$0 sm:$0xff]  ;;  %vm393_vm0 = vcmask 1047556   ;;  %vm533_vm2 = vcmask 519168  }
  0x15   : > { %v916_v1 = vld [vmem:[%s1080_s3] ss:$0 sm:$0xff] }
  0x16   : > { %s676_s30 = sshll.u32 %s902_s29, 4  ;;  %s678_s29 = sshll.u32 %s808_s18, 4 }
  0x17   : > { %s270_s7 = scalar_lea.vmem %s1077_s0, %s676_s30  ;;  %s284_s14 = scalar_lea.vmem %s1078_s1, %s676_s30 }
  0x18   : > { %v295_v2 = vld [vmem:[%s270_s7 + $0x4] sm:$0x3]  ;;  %v294_v3 = vld [vmem:[%s270_s7 + $0x2] sm:$0x3]  ;;  %v299_v4 = vld [vmem:[%s270_s7 + $0xc] sm:$0x3]  ;;  %s556_s6 = scalar_lea.hbm %s1081_s4, %s678_s29 }
  0x19   : > { %v303_v5 = vunpack.c.l.bf16 %v295_v2  ;;  %v302_v6 = vunpack.c.l.bf16 %v294_v3  ;;  %v307_v7 = vunpack.c.l.bf16 %v299_v4  ;;  %v293_v8 = vld [vmem:[%s270_s7] sm:$0x3]  ;;  %v297_v9 = vld [vmem:[%s270_s7 + $0x8] sm:$0x3]  ;;  %v296_v10 = vld [vmem:[%s270_s7 + $0x6] sm:$0x3] }
  0x1a   : > { %v301_v11 = vunpack.c.l.bf16 %v293_v8  ;;  %v300_v12 = vld [vmem:[%s270_s7 + $0xe] sm:$0x3]  ;;  %v304_v13 = vunpack.c.l.bf16 %v296_v10  ;;  %v298_v14 = vld [vmem:[%s270_s7 + $0xa] sm:$0x3]  ;;  %v305_v17 = vunpack.c.l.bf16 %v297_v9  ;;  %v667_v36 = vld [vmem:[%s284_s14 + $0x2] sm:$0x3] }
  0x1b   : > { %v314_v15 = vmul.f32 %v736_v0, %v303_v5  ;;  %v313_v16 = vmul.f32 %v736_v0, %v302_v6  ;;  %v308_v19 = vunpack.c.l.bf16 %v300_v12  ;;  %v306_v21 = vunpack.c.l.bf16 %v298_v14  ;;  %s557_s18 = sshll.u32 %s1012_s26, 4  ;;  %s559_s7 = sshll.u32 %s556_s6, 4  ;;  %s558_s18 = int_to_ptr.vmem [resolvable:$true] %s557_s18  ;;  %s560_s7 = int_to_ptr.hbm [resolvable:$true] %s559_s7 }
  0x1c   : > { %v312_v18 = vmul.f32 %v736_v0, %v301_v11  ;;  %v315_v20 = vmul.f32 %v736_v0, %v304_v13  ;;  %v318_v24 = vmul.f32 %v736_v0, %v307_v7  ;;  %v316_v29 = vmul.f32 %v736_v0, %v305_v17  ;;  %s752_s9 = sshra.s32 %s560_s7, 4  ;;  %s753_s9 = int_to_ptr.hbm [resolvable:$true] %s752_s9 }
  0x1d   : > { %v325_v22 = vadd.f32 %v916_v1, %v314_v15  ;;  %v324_v23 = vadd.f32 %v916_v1, %v313_v16  ;;  %v319_v31 = vmul.f32 %v736_v0, %v308_v19  ;;  %v317_v33 = vmul.f32 %v736_v0, %v306_v21  ;;  %s754_s10 = scalar_lea.hbm %s753_s9, 16  ;;  %p759_p1 = scmp.lt.s32.totalorder %s753_s9, %s1081_s4 }
  0x1e   : > { %v323_v25 = vadd.f32 %v916_v1, %v312_v18  ;;  %v326_v26 = vadd.f32 %v916_v1, %v315_v20  ;;  %v329_v34 = vadd.f32 %v916_v1, %v318_v24  ;;  %v327_v35 = vadd.f32 %v916_v1, %v316_v29  ;;  %p755_p12 = scmp.ne.s32.totalorder %s753_s9, %s754_s10  ;;  %p760_p2 = scmp.lt.s32.totalorder %s758_s13, %s754_s10 }
  0x1f   : > { %v922_v27 = vmax.f32 %v325_v22, 0.0  ;;  %v924_v28 = vmax.f32 %v324_v23, 0.0  ;;  %v330_v37 = vadd.f32 %v916_v1, %v319_v31  ;;  %v328_v38 = vadd.f32 %v916_v1, %v317_v33 }
  0x20   : > { %v926_v30 = vmax.f32 %v323_v25, 0.0  ;;  %v928_v32 = vmax.f32 %v326_v26, 0.0  ;;  %v504_v39 = vunpack.c.l.bf16 %v667_v36  ;;  %v949_v40 = vmax.f32 %v329_v34, 0.0  ;;  %p756_p13 = pnand %p755_p12, %p885_p4  ;;  %p761_p3 = por %p760_p2, %p759_p1 }
  0x21   : > { %462 = vrot.lane.b32.xlu1 %v922_v27, %s818_s21  ;;  %356 = vst [vmem:[#allocation1 + $0x20] ss:$2 sm:$0xff] %v922_v27  ;;  %460 = vrot.lane.b32.xlu0 %v924_v28, %s818_s21  ;;  %v951_v41 = vmax.f32 %v327_v35, 0.0  ;;  %v953_v44 = vmax.f32 %v330_v37, 0.0  ;;  %v955_v45 = vmax.f32 %v328_v38, 0.0 }
  0x22   : > { %353 = vst [vmem:[#allocation1 + $0x10] ss:$2 sm:$0xff] %v924_v28  ;;  %458 = vrot.lane.b32.xlu2 %v926_v30, %s818_s21  ;;  %v505_v42 = vmul.f32 %v736_v0, %v504_v39  ;;  %p757_p0 = pneg %p756_p13 }
  0x23   : > { %350 = vst [vmem:[#allocation1] ss:$2 sm:$0xff] %v926_v30 }
  0x24   : > { %359 = vst [vmem:[#allocation1 + $0x30] ss:$2 sm:$0xff] %v928_v32  ;;  %v506_v49 = vadd.f32 %v916_v1, %v505_v42  ;;  %v339_v1 = vlaneseq  ;;  %p762_p5 = pnand %p761_p3, %p757_p0 }
  0x26   : > { %v507_v50 = vmax.f32 %v506_v49, 0.0  ;;  %v982_v7 = vshrl.u32 %v339_v1, 7 }
  0x28   : > { %v357_v43 = vld.sshfl [vmem:[#allocation1 + $0x20] sm:$0xff pattern:$0x75316420]  ;;  %vm341_vm1 = vcmp.eq.s32.totalorder %v982_v7, 0 }
  0x29   : > { %373 = vrot.lane.b32.xlu1 %v357_v43, %s818_s21  ;;  %365 = vst [vmem:[#allocation1 + $0x20] ss:$2 sm:$0xff] %v949_v40  ;;  %v354_v46 = vld.sshfl [vmem:[#allocation1 + $0x10] sm:$0xff pattern:$0x75316420] }
  0x2a   : > { %v351_v47 = vld.sshfl [vmem:[#allocation1] sm:$0xff pattern:$0x75316420]  ;;  %363 = vst [vmem:[#allocation1 + $0x10] ss:$2 sm:$0xff] %v955_v45  ;;  %464 = vrot.lane.b32.xlu2 %v928_v32, %s818_s21 }
  0x2b   : > { %369 = vrot.lane.b32.xlu0 %v351_v47, %s818_s21  ;;  %361 = vst [vmem:[#allocation1] ss:$2 sm:$0xff] %v951_v41  ;;  %v360_v48 = vld.sshfl [vmem:[#allocation1 + $0x30] sm:$0xff pattern:$0x75316420] }
  0x2c   : > { %367 = vst [vmem:[#allocation1 + $0x30] ss:$2 sm:$0xff] %v953_v44 }
  0x30   : > { %v366_v53 = vld.sshfl [vmem:[#allocation1 + $0x20] sm:$0xff pattern:$0x75316420] }
  0x31   : > { %375 = vrot.lane.b32.xlu1 %v360_v48, %s818_s21  ;;  %v364_v54 = vld.sshfl [vmem:[#allocation1 + $0x10] sm:$0xff pattern:$0x75316420] }
  0x32   : > { %v362_v51 = vld.sshfl [vmem:[#allocation1] sm:$0xff pattern:$0x75316420] }
  0x33   : > { %371 = vrot.lane.b32.xlu0 %v354_v46, %s818_s21  ;;  %377 = vrot.lane.b32.xlu2 %v362_v51, %s818_s21  ;;  %509 = vst [vmem:[#allocation1] ss:$2 sm:$0xff] %v507_v50  ;;  %v368_v52 = vld.sshfl [vmem:[#allocation1 + $0x30] sm:$0xff pattern:$0x75316420] }
  0x39   : > { %383 = vrot.lane.b32.xlu1 %v368_v52, %s818_s21 }
  0x3b   : > { %381 = vrot.lane.b32.xlu0 %v366_v53, %s818_s21  ;;  %379 = vrot.lane.b32.xlu2 %v364_v54, %s818_s21 }
  0x41   : > { %468 = vrot.lane.b32.xlu1 %v955_v45, %s818_s21 }
  0x43   : > { %466 = vrot.lane.b32.xlu0 %v951_v41, %s818_s21  ;;  %470 = vrot.lane.b32.xlu2 %v949_v40, %s818_s21 }
  0x4b   : > { %472 = vrot.lane.b32.xlu0 %v953_v44, %s818_s21 }
  0x7c   : > { %v459_v55 = vpop.permute.xlu2 %458 }
  0x7d   : > { %v482_v25 = vmax.f32 %v926_v30, %v459_v55 }
  0x84   : > { %v465_v56 = vpop.permute.xlu2 %464 }
  0x85   : > { %v485_v33 = vmax.f32 %v928_v32, %v465_v56 }
  0x8d   : > { %v378_v59 = vpop.permute.xlu2 %377 }
  0x8e   : > { %v402_v10 = vrot.slane %v378_v59, 4 }
  0x90   : > { %v403_v20 = vsel %vm393_vm0, %v402_v10, %v378_v59 }
  0x91   : > { %v414_v34 = vrot.slane %v403_v20, 4 }
  0x93   : > { %v463_v57 = vpop.permute.xlu1 %462  ;;  %v461_v58 = vpop.permute.xlu0 %460  ;;  %v422_v53 = vsel %vm393_vm0, %v414_v34, %v378_v59 }
  0x94   : > { %v484_v31 = vmax.f32 %v922_v27, %v463_v57  ;;  %v483_v42 = vmax.f32 %v924_v28, %v461_v58  ;;  %v438_v58 = vrot.slane %v422_v53, 3 }
  0x95   : > { %v380_v4 = vpop.permute.xlu2 %379 }
  0x96   : > { %v404_v6 = vrot.slane %v380_v4, 4 }
  0x98   : > { %v405_v14 = vsel %vm393_vm0, %v404_v6, %v380_v4 }
  0x99   : > { %v415_v22 = vrot.slane %v405_v14, 4 }
  0x9b   : > { %v374_v60 = vpop.permute.xlu1 %373  ;;  %v423_v39 = vsel %vm393_vm0, %v415_v22, %v380_v4  ;;  %v454_v4 = vsel %vm341_vm1, 0.0, %v438_v58 }
  0x9c   : > { %v398_v61 = vrot.slane %v374_v60, 4  ;;  %v439_v52 = vrot.slane %v423_v39, 3 }
  0x9d   : > { %v370_v62 = vpop.permute.xlu0 %369 }
  0x9e   : > { %v399_v63 = vsel %vm393_vm0, %v398_v61, %v374_v60  ;;  %v394_v0 = vrot.slane %v370_v62, 4  ;;  %v455_v59 = vsel %vm341_vm1, 0.0, %v439_v52 }
  0x9f   : > { %v412_v2 = vrot.slane %v399_v63, 4 }
  0xa0   : > { %v395_v3 = vsel %vm393_vm0, %v394_v0, %v370_v62 }
  0xa1   : > { %v410_v5 = vrot.slane %v395_v3, 4  ;;  %v420_v8 = vsel %vm393_vm0, %v412_v2, %v374_v60 }
  0xa2   : > { %v436_v15 = vrot.slane %v420_v8, 3 }
  0xa3   : > { %v376_v9 = vpop.permute.xlu1 %375  ;;  %v418_v12 = vsel %vm393_vm0, %v410_v5, %v370_v62 }
  0xa4   : > { %v400_v11 = vrot.slane %v376_v9, 4  ;;  %v434_v19 = vrot.slane %v418_v12, 3  ;;  %v452_v26 = vsel %vm341_vm1, 0.0, %v436_v15 }
  0xa5   : > { %v372_v13 = vpop.permute.xlu0 %371  ;;  %v492_v43 = vmax.f32 %v484_v31, %v452_v26 }
  0xa6   : > { %v401_v16 = vsel %vm393_vm0, %v400_v11, %v376_v9  ;;  %v396_v17 = vrot.slane %v372_v13, 4  ;;  %v450_v37 = vsel %vm341_vm1, 0.0, %v434_v19 }
  0xa7   : > { %v413_v18 = vrot.slane %v401_v16, 4  ;;  %v490_v49 = vmax.f32 %v482_v25, %v450_v37 }
  0xa8   : > { %v397_v21 = vsel %vm393_vm0, %v396_v17, %v372_v13 }
  0xa9   : > { %v421_v23 = vsel %vm393_vm0, %v413_v18, %v376_v9  ;;  %v411_v24 = vrot.slane %v397_v21, 4  ;;  %v471_v9 = vpop.permute.xlu2 %470 }
  0xaa   : > { %v437_v29 = vrot.slane %v421_v23, 3  ;;  %v488_v11 = vmax.f32 %v949_v40, %v471_v9 }
  0xab   : > { %v419_v35 = vsel %vm393_vm0, %v411_v24, %v372_v13  ;;  %v384_v36 = vpop.permute.xlu1 %383 }
  0xac   : > { %v453_v30 = vsel %vm341_vm1, 0.0, %v437_v29  ;;  %v435_v38 = vrot.slane %v419_v35, 3  ;;  %v408_v27 = vrot.slane %v384_v36, 4 }
  0xad   : > { %v493_v46 = vmax.f32 %v485_v33, %v453_v30  ;;  %v382_v32 = vpop.permute.xlu0 %381 }
  0xae   : > { %v451_v47 = vsel %vm341_vm1, 0.0, %v435_v38  ;;  %v406_v48 = vrot.slane %v382_v32, 4  ;;  %v409_v56 = vsel %vm393_vm0, %v408_v27, %v384_v36 }
  0xaf   : > { %v499_v50 = vmax.f32 %v492_v43, %v493_v46  ;;  %v491_v51 = vmax.f32 %v483_v42, %v451_v47  ;;  %v417_v62 = vrot.slane %v409_v56, 4 }
  0xb0   : > { %v407_v54 = vsel %vm393_vm0, %v406_v48, %v382_v32 }
  0xb1   : > { %v498_v28 = vmax.f32 %v490_v49, %v491_v51  ;;  %v535_v55 = vmax.f32 %v499_v50, %v491_v51  ;;  %v416_v57 = vrot.slane %v407_v54, 4  ;;  %v425_v5 = vsel %vm393_vm0, %v417_v62, %v384_v36 }
  0xb3   : > { %v532_v60 = vmax.f32 %v498_v28, 0.0  ;;  %668 = vst.msk [vmem:[%s1012_s26 + $0x4] sm:$0xf] %vm533_vm2, %v535_v55  ;;  %v469_v61 = vpop.permute.xlu1 %468  ;;  %v424_v1 = vsel %vm393_vm0, %v416_v57, %v382_v32 }
  0xb4   : > { %v487_v63 = vmax.f32 %v955_v45, %v469_v61  ;;  %v440_v8 = vrot.slane %v424_v1, 3  ;;  %v441_v45 = vrot.slane %v425_v5, 3 }
  0xb5   : > { %534 = vst.msk [vmem:[%s1012_s26] sm:$0xf] %vm533_vm2, %v532_v60  ;;  %v467_v0 = vpop.permute.xlu0 %466 }
  0xb6   : > { %v495_v2 = vmax.f32 %v487_v63, %v455_v59  ;;  %v486_v3 = vmax.f32 %v951_v41, %v467_v0  ;;  %v456_v41 = vsel %vm341_vm1, 0.0, %v440_v8  ;;  %v457_v15 = vsel %vm341_vm1, 0.0, %v441_v45 }
  0xb7   : > { %v496_v40 = vmax.f32 %v488_v11, %v456_v41 }
  0xb8   : > { %v494_v6 = vmax.f32 %v486_v3, %v454_v4 }
  0xba   : > { %v500_v10 = vmax.f32 %v494_v6, %v495_v2 }
  0xbc   : > { %v536_v12 = vmax.f32 %v500_v10, %v493_v46 }
  0xbd   : > { %v473_v13 = vpop.permute.xlu0 %472 }
  0xbe   : > { %669 = vst.msk [vmem:[%s1012_s26 + $0x8] sm:$0xf] %vm533_vm2, %v536_v12  ;;  %v489_v14 = vmax.f32 %v953_v44, %v473_v13 }
  0xc0   : > { %v497_v16 = vmax.f32 %v489_v14, %v457_v15 }
  0xc2   : > { %v501_v17 = vmax.f32 %v496_v40, %v497_v16 }
  0xc4   : > { %v537_v18 = vmax.f32 %v501_v17, %v495_v2 }
  0xc6   : > { %670 = vst.msk [vmem:[%s1012_s26 + $0xc] sm:$0xf] %vm533_vm2, %v537_v18 }
  0xc7   : > { %765 = shalt.err (!%p762_p5)
}
  0xc8   : > { %s819_s22 = smov 4  }
  0xc9   : > { %679 = dma.vmem_to_hbm [thread:$0]  (%p885_p4), %s558_s18, 256, %s560_s7, %s543_s8, %s818_s21, %s818_s21, %s819_s22  }
  0xca PF: > { %p685_p6 = scmp.ge.s32.totalorder %s816_s20, 2  ;;  %s574_s26 = sand.u32 1, %s796_s15  }
  0xcb   : > { %s575_s29 = scalar_lea.sflag [#allocation3], %s574_s26 }
  0xcc   : > { %p682_p7 = pnand %p685_p6, %p892_p8 }
  0xce   : > { %p683_p9 = pneg %p682_p7 }
  0xd0   : > { %791 = dma.done.wait (%p683_p9), %s575_s29, 256  }
  0xd1   : > { %793 = vsyncadd (%p683_p9), %s575_s29, 4294967040  ;;  %s17_s20 = sadd.s32 1, %s816_s20   ;;  %s1084_s15 = smov %s800_s16 }
  0xd2   : > { %p14_p10 = scmp.ge.s32.totalorder %s17_s20, 4   ;;  %s1085_s16 = smov %s804_s17 }
  0xd3   : > { %s1086_s17 = smov %s898_s28  ;;  %s1087_s18 = smov %s812_s19 }
  0xd4   : > { %s1088_s19 = smov %s1090_s23  ;;  %16 = sbr.rel (!%p14_p10) target bundleno = 4 (0x4), region = 79 }
  0xd9   :  { %581 = vsyncpa [#allocation3], 1 }
  0xda   :  { %583 = vsyncpa [#allocation3 + $0x1], 1 }

</bundles_post_ra>
